<compile_context>
chip_gen: v7x
topology: tpu7x:2x2x1
jax: 0.10.0
libtpu: 0.0.40
codegen_flags: <defaults>
</compile_context>

<pallas_src>
import jax
import jax.numpy as jnp
from jax.experimental import pallas as pl
from jax.experimental.pallas import tpu as pltpu


def _round_up(x, m):
    return (x + m - 1) // m * m


def fused_conv3x3_stack(x_nchw, stages):
    """Run a stack of (3x3, stride 1, SAME) conv [+ ReLU] stages in one Pallas kernel.

    stages: list of (weight (Cout, Cin, 3, 3), bias (Cout,), apply_relu: bool).
    Input / output are NCHW float32.
    """
    n, cin0, h, w = x_nchw.shape
    hp, wp = h + 2, w + 2                       # zero-padded grid for SAME conv
    spad = hp * wp                              # flattened padded-grid size
    lw = _round_up(spad, 128)                   # compute-canvas lanes (lane-dense)
    margin = _round_up(wp + 1, 128)             # >= largest tap shift, lane-aligned
    tail = _round_up(wp + 1, 128)               # right guard band, lane-aligned
    lin = margin + lw + tail                    # input/scratch canvas lanes
    # Tap t = kh*3 + kw corresponds to a flat shift of (kh-1)*Wp + (kw-1).
    dps = tuple((kh - 1) * wp + (kw - 1) for kh in range(3) for kw in range(3))

    n_stages = len(stages)
    w_taps, biases, couts = [], [], []
    cin = cin0
    for wt, bs, _relu in stages:
        co, ci, kh_, kw_ = wt.shape
        assert (kh_, kw_) == (3, 3) and ci == cin, (wt.shape, cin)
        # (Cout, Cin, 3, 3) -> (9, Cout, Cin), tap-major, matching `dps` order.
        w_taps.append(
            jnp.transpose(wt, (2, 3, 0, 1)).reshape(9, co, ci).astype(jnp.float32))
        biases.append(bs.reshape(co, 1).astype(jnp.float32))
        couts.append(co)
        cin = co
    relus = tuple(bool(s[2]) for s in stages)
    c_out_final = couts[-1]

    # Interior mask of the padded grid: 1 on real pixels, 0 on the padding ring
    # and on the lane round-up tail.  Precomputed so the kernel needs no
    # integer div/mod on the VPU.
    pos = jnp.arange(lw, dtype=jnp.int32)
    row, col = pos // wp, pos % wp
    interior = (row >= 1) & (row <= h) & (col >= 1) & (col <= w)
    mask = interior.astype(jnp.float32).reshape(1, lw)

    # Input canvas: (N, Cin0, LIN).  Zero-padded image, flattened row-major,
    # placed at lane offset `margin`; zeros everywhere else.
    xp = jnp.pad(x_nchw.astype(jnp.float32),
                 ((0, 0), (0, 0), (1, 1), (1, 1))).reshape(n, cin0, spad)
    x_canvas = jnp.pad(xp, ((0, 0), (0, 0), (margin, lin - margin - spad)))

    def kernel(*refs):
        x_ref = refs[0]                               # (Cin0, LIN)
        wb_refs = refs[1:1 + 2 * n_stages]            # (9,Co,Ci), (Co,1) per stage
        mask_ref = refs[1 + 2 * n_stages]             # (1, LW)
        o_ref = refs[2 + 2 * n_stages]                # (Cout_last, LW)
        canvases = refs[3 + 2 * n_stages:]            # VMEM scratch per hidden stage

        src = x_ref                                   # current input canvas ref
        for s in range(n_stages):
            w_ref = wb_refs[2 * s]
            b_ref = wb_refs[2 * s + 1]
            co = couts[s]
            # Bias folded into accumulator init (one fewer (Co, LW) add later).
            acc = jnp.broadcast_to(b_ref[...], (co, lw)).astype(jnp.float32)
            # In-kernel im2col: 9 statically shifted lane slices, accumulated
            # on the MXU with an f32 accumulator.
            for t, dp in enumerate(dps):
                xs = src[:, pl.ds(margin + dp, lw)]   # (Cin_s, LW)
                acc = acc + jnp.dot(w_ref[t], xs,
                                    preferred_element_type=jnp.float32)
            if relus[s]:
                acc = jnp.maximum(acc, 0.0)           # ReLU fused in epilogue
            if s == n_stages - 1:
                o_ref[...] = acc.astype(o_ref.dtype)  # lane-dense (Co, 384) store
            else:
                # Re-embed into a margin-padded VMEM canvas so the next conv can
                # take shifted slices.  Each region is written exactly once per
                # grid step (all slices lane-aligned to 128):
                #   [0, margin)            -> zeros (left guard band)
                #   [margin, margin+LW)    -> masked activation (ring/tail -> 0)
                #   [margin+LW, LIN)       -> zeros (right guard band)
                canvas = canvases[s]
                canvas[:, pl.ds(0, margin)] = jnp.zeros((co, margin), jnp.float32)
                canvas[:, pl.ds(margin, lw)] = acc * mask_ref[...]
                canvas[:, pl.ds(margin + lw, tail)] = jnp.zeros((co, tail),
                                                                jnp.float32)
                src = canvas

    in_specs = [pl.BlockSpec((None, cin0, lin), lambda i: (i, 0, 0))]
    args = [x_canvas]
    for wt, bs in zip(w_taps, biases):
        in_specs.append(pl.BlockSpec(wt.shape, lambda i: (0, 0, 0)))
        in_specs.append(pl.BlockSpec(bs.shape, lambda i: (0, 0)))
        args.extend([wt, bs])
    in_specs.append(pl.BlockSpec((1, lw), lambda i: (0, 0)))
    args.append(mask)

    out_canvas = pl.pallas_call(
        kernel,
        out_shape=jax.ShapeDtypeStruct((n, c_out_final, lw), jnp.float32),
        grid_spec=pltpu.PrefetchScalarGridSpec(
            num_scalar_prefetch=0,
            grid=(n,),
            in_specs=in_specs,
            out_specs=pl.BlockSpec((None, c_out_final, lw), lambda i: (i, 0, 0)),
            scratch_shapes=[pltpu.VMEM((co, lin), jnp.float32)
                            for co in couts[:-1]],
        ),
        compiler_params=pltpu.CompilerParams(
            dimension_semantics=("parallel",)),
    )(*args)

    # Extract the valid H x W window from the padded-grid canvas -> NCHW.
    out = out_canvas[:, :, :spad].reshape(n, c_out_final, hp, wp)
    return out[:, :, 1:1 + h, 1:1 + w]


class FeatExtPallas:
    """Mirrors FeatExt: keep modules up to & including `output_layer`, run them fused."""

    def __init__(self, pretrained_modules, output_layer):
        layers = list(pretrained_modules.keys())
        layer_count = 0
        for l in layers:
            if l != output_layer:
                layer_count += 1
            else:
                break
        kept = layers[:layer_count + 1]      # keep up to & including output_layer
        self.net = [(name, pretrained_modules[name]) for name in kept]

        # Group the kept modules into fused (conv3x3 [+ ReLU]) stages.
        stages = []
        for _name, (kind, params) in self.net:
            if kind == "conv":
                stages.append([params["weight"], params["bias"], False])
            elif kind == "relu":
                if not stages:
                    # TODO(synk): leading ReLU with no preceding conv not supported.
                    raise NotImplementedError("ReLU before any conv")
                stages[-1][2] = True
            else:
                # TODO(synk): only 3x3-conv/ReLU backbones are fused here;
                # truncated layers (pool/fc) never execute in FeatExt anyway.
                raise NotImplementedError(kind)
        self._stages = [tuple(s) for s in stages]

    def __call__(self, x):
        return fused_conv3x3_stack(x, self._stages)


if __name__ == "__main__":
    key = jax.random.PRNGKey(0)
    kw1, kw2, kfc, kx = jax.random.split(key, 4)

    # Deterministic synthetic "pretrained" backbone parameters.
    w1 = jax.random.normal(kw1, (8, 4, 3, 3), jnp.float32) * 0.1
    b1 = jnp.linspace(-0.1, 0.1, 8).astype(jnp.float32)
    w2 = jax.random.normal(kw2, (16, 8, 3, 3), jnp.float32) * 0.1
    b2 = jnp.linspace(-0.05, 0.05, 16).astype(jnp.float32)
    wfc = jax.random.normal(kfc, (10, 16), jnp.float32) * 0.1   # truncated away

    pretrained_modules = {
        "conv1": ("conv", {"weight": w1, "bias": b1}),
        "relu1": ("relu", {}),
        "conv2": ("conv", {"weight": w2, "bias": b2}),
        "relu2": ("relu", {}),
        "pool":  ("pool", {}),                # removed by truncation
        "fc":    ("fc", {"weight": wfc}),     # removed by truncation
    }

    model = FeatExtPallas(pretrained_modules, output_layer="relu2")
    fwd = jax.jit(lambda inp: model(inp))

    x = jax.random.normal(kx, (2, 4, 16, 16), jnp.float32)      # NCHW, like PyTorch
    y = jax.block_until_ready(fwd(x))
    assert y.shape == (2, 16, 16, 16), y.shape

    # Cross-check against a plain-JAX (lax conv) reference.
    def ref_forward(inp):
        hh = jax.lax.conv_general_dilated(
            inp, w1, (1, 1), "SAME",
            dimension_numbers=("NCHW", "OIHW", "NCHW")) + b1[None, :, None, None]
        hh = jnp.maximum(hh, 0.0)
        hh = jax.lax.conv_general_dilated(
            hh, w2, (1, 1), "SAME",
            dimension_numbers=("NCHW", "OIHW", "NCHW")) + b2[None, :, None, None]
        return jnp.maximum(hh, 0.0)

    y_ref = jax.block_until_ready(ref_forward(x))
    assert jnp.allclose(y, y_ref, atol=1e-4, rtol=1e-4)

    print("KERNEL_OK")
</pallas_src>

<mosaic_0001>
module attributes {stable_mosaic.version = 11 : i64} {
  func.func @kernel(%arg0: i32, %arg1: memref<1x4x640xf32, #tpu.memory_space<vmem>>, %arg2: memref<9x8x4xf32, #tpu.memory_space<vmem>>, %arg3: memref<8x1xf32, #tpu.memory_space<vmem>>, %arg4: memref<9x16x8xf32, #tpu.memory_space<vmem>>, %arg5: memref<16x1xf32, #tpu.memory_space<vmem>>, %arg6: memref<1x384xf32, #tpu.memory_space<vmem>>, %arg7: memref<1x16x384xf32, #tpu.memory_space<vmem>>, %arg8: memref<8x640xf32, #tpu.memory_space<vmem>>) attributes {dimension_semantics = [#tpu.dimension_semantics<parallel>], iteration_bounds = array<i64: 2>, scalar_prefetch = 0 : i64, scratch_operands = 1 : i64, tpu.core_type = #tpu.core_type<tc>, window_params = [{transform_indices = @transform_0, window_bounds = array<i64: 1, 4, 640>}, {pipeline_mode = #tpu.pipeline_mode<synchronous>, transform_indices = @transform_1, window_bounds = array<i64: 9, 8, 4>}, {pipeline_mode = #tpu.pipeline_mode<synchronous>, transform_indices = @transform_2, window_bounds = array<i64: 8, 1>}, {pipeline_mode = #tpu.pipeline_mode<synchronous>, transform_indices = @transform_3, window_bounds = array<i64: 9, 16, 8>}, {pipeline_mode = #tpu.pipeline_mode<synchronous>, transform_indices = @transform_4, window_bounds = array<i64: 16, 1>}, {pipeline_mode = #tpu.pipeline_mode<synchronous>, transform_indices = @transform_5, window_bounds = array<i64: 1, 384>}, {transform_indices = @transform_6, window_bounds = array<i64: 1, 16, 384>}]} {
    %c0 = arith.constant 0 : index
    %c0_0 = arith.constant 0 : index
    %0 = vector.load %arg3[%c0, %c0_0] : memref<8x1xf32, #tpu.memory_space<vmem>>, vector<8x1xf32>
    %1 = vector.shape_cast %0 : vector<8x1xf32> to vector<8x1xf32>
    %2 = vector.broadcast %1 : vector<8x1xf32> to vector<8x384xf32>
    %c0_1 = arith.constant 0 : index
    %c0_2 = arith.constant 0 : index
    %c109 = arith.constant 109 : index
    %3 = vector.load %arg1[%c0_1, %c0_2, %c109] : memref<1x4x640xf32, #tpu.memory_space<vmem>>, vector<1x4x384xf32>
    %4 = vector.shape_cast %3 : vector<1x4x384xf32> to vector<4x384xf32>
    %c0_3 = arith.constant 0 : index
    %c0_4 = arith.constant 0 : index
    %c0_5 = arith.constant 0 : index
    %5 = vector.load %arg2[%c0_3, %c0_4, %c0_5] : memref<9x8x4xf32, #tpu.memory_space<vmem>>, vector<1x8x4xf32>
    %6 = vector.shape_cast %5 : vector<1x8x4xf32> to vector<8x4xf32>
    %cst = arith.constant dense<0.000000e+00> : vector<8x384xf32>
    %7 = tpu.matmul %6, %4, %cst {dimension_numbers = #tpu.dot_dimension_numbers<[1], [0], [0], [1], [0, 0, 1, 1], [], []>} : vector<8x4xf32>, vector<4x384xf32>, vector<8x384xf32> -> vector<8x384xf32>
    %8 = arith.addf %2, %7 : vector<8x384xf32>
    %c0_6 = arith.constant 0 : index
    %c0_7 = arith.constant 0 : index
    %c110 = arith.constant 110 : index
    %9 = vector.load %arg1[%c0_6, %c0_7, %c110] : memref<1x4x640xf32, #tpu.memory_space<vmem>>, vector<1x4x384xf32>
    %10 = vector.shape_cast %9 : vector<1x4x384xf32> to vector<4x384xf32>
    %c1 = arith.constant 1 : index
    %c0_8 = arith.constant 0 : index
    %c0_9 = arith.constant 0 : index
    %11 = vector.load %arg2[%c1, %c0_8, %c0_9] : memref<9x8x4xf32, #tpu.memory_space<vmem>>, vector<1x8x4xf32>
    %12 = vector.shape_cast %11 : vector<1x8x4xf32> to vector<8x4xf32>
    %cst_10 = arith.constant dense<0.000000e+00> : vector<8x384xf32>
    %13 = tpu.matmul %12, %10, %cst_10 {dimension_numbers = #tpu.dot_dimension_numbers<[1], [0], [0], [1], [0, 0, 1, 1], [], []>} : vector<8x4xf32>, vector<4x384xf32>, vector<8x384xf32> -> vector<8x384xf32>
    %14 = arith.addf %8, %13 : vector<8x384xf32>
    %c0_11 = arith.constant 0 : index
    %c0_12 = arith.constant 0 : index
    %c111 = arith.constant 111 : index
    %15 = vector.load %arg1[%c0_11, %c0_12, %c111] : memref<1x4x640xf32, #tpu.memory_space<vmem>>, vector<1x4x384xf32>
    %16 = vector.shape_cast %15 : vector<1x4x384xf32> to vector<4x384xf32>
    %c2 = arith.constant 2 : index
    %c0_13 = arith.constant 0 : index
    %c0_14 = arith.constant 0 : index
    %17 = vector.load %arg2[%c2, %c0_13, %c0_14] : memref<9x8x4xf32, #tpu.memory_space<vmem>>, vector<1x8x4xf32>
    %18 = vector.shape_cast %17 : vector<1x8x4xf32> to vector<8x4xf32>
    %cst_15 = arith.constant dense<0.000000e+00> : vector<8x384xf32>
    %19 = tpu.matmul %18, %16, %cst_15 {dimension_numbers = #tpu.dot_dimension_numbers<[1], [0], [0], [1], [0, 0, 1, 1], [], []>} : vector<8x4xf32>, vector<4x384xf32>, vector<8x384xf32> -> vector<8x384xf32>
    %20 = arith.addf %14, %19 : vector<8x384xf32>
    %c0_16 = arith.constant 0 : index
    %c0_17 = arith.constant 0 : index
    %c127 = arith.constant 127 : index
    %21 = vector.load %arg1[%c0_16, %c0_17, %c127] : memref<1x4x640xf32, #tpu.memory_space<vmem>>, vector<1x4x384xf32>
    %22 = vector.shape_cast %21 : vector<1x4x384xf32> to vector<4x384xf32>
    %c3 = arith.constant 3 : index
    %c0_18 = arith.constant 0 : index
    %c0_19 = arith.constant 0 : index
    %23 = vector.load %arg2[%c3, %c0_18, %c0_19] : memref<9x8x4xf32, #tpu.memory_space<vmem>>, vector<1x8x4xf32>
    %24 = vector.shape_cast %23 : vector<1x8x4xf32> to vector<8x4xf32>
    %cst_20 = arith.constant dense<0.000000e+00> : vector<8x384xf32>
    %25 = tpu.matmul %24, %22, %cst_20 {dimension_numbers = #tpu.dot_dimension_numbers<[1], [0], [0], [1], [0, 0, 1, 1], [], []>} : vector<8x4xf32>, vector<4x384xf32>, vector<8x384xf32> -> vector<8x384xf32>
    %26 = arith.addf %20, %25 : vector<8x384xf32>
    %c0_21 = arith.constant 0 : index
    %c0_22 = arith.constant 0 : index
    %c128 = arith.constant 128 : index
    %27 = vector.load %arg1[%c0_21, %c0_22, %c128] : memref<1x4x640xf32, #tpu.memory_space<vmem>>, vector<1x4x384xf32>
    %28 = vector.shape_cast %27 : vector<1x4x384xf32> to vector<4x384xf32>
    %c4 = arith.constant 4 : index
    %c0_23 = arith.constant 0 : index
    %c0_24 = arith.constant 0 : index
    %29 = vector.load %arg2[%c4, %c0_23, %c0_24] : memref<9x8x4xf32, #tpu.memory_space<vmem>>, vector<1x8x4xf32>
    %30 = vector.shape_cast %29 : vector<1x8x4xf32> to vector<8x4xf32>
    %cst_25 = arith.constant dense<0.000000e+00> : vector<8x384xf32>
    %31 = tpu.matmul %30, %28, %cst_25 {dimension_numbers = #tpu.dot_dimension_numbers<[1], [0], [0], [1], [0, 0, 1, 1], [], []>} : vector<8x4xf32>, vector<4x384xf32>, vector<8x384xf32> -> vector<8x384xf32>
    %32 = arith.addf %26, %31 : vector<8x384xf32>
    %c0_26 = arith.constant 0 : index
    %c0_27 = arith.constant 0 : index
    %c129 = arith.constant 129 : index
    %33 = vector.load %arg1[%c0_26, %c0_27, %c129] : memref<1x4x640xf32, #tpu.memory_space<vmem>>, vector<1x4x384xf32>
    %34 = vector.shape_cast %33 : vector<1x4x384xf32> to vector<4x384xf32>
    %c5 = arith.constant 5 : index
    %c0_28 = arith.constant 0 : index
    %c0_29 = arith.constant 0 : index
    %35 = vector.load %arg2[%c5, %c0_28, %c0_29] : memref<9x8x4xf32, #tpu.memory_space<vmem>>, vector<1x8x4xf32>
    %36 = vector.shape_cast %35 : vector<1x8x4xf32> to vector<8x4xf32>
    %cst_30 = arith.constant dense<0.000000e+00> : vector<8x384xf32>
    %37 = tpu.matmul %36, %34, %cst_30 {dimension_numbers = #tpu.dot_dimension_numbers<[1], [0], [0], [1], [0, 0, 1, 1], [], []>} : vector<8x4xf32>, vector<4x384xf32>, vector<8x384xf32> -> vector<8x384xf32>
    %38 = arith.addf %32, %37 : vector<8x384xf32>
    %c0_31 = arith.constant 0 : index
    %c0_32 = arith.constant 0 : index
    %c145 = arith.constant 145 : index
    %39 = vector.load %arg1[%c0_31, %c0_32, %c145] : memref<1x4x640xf32, #tpu.memory_space<vmem>>, vector<1x4x384xf32>
    %40 = vector.shape_cast %39 : vector<1x4x384xf32> to vector<4x384xf32>
    %c6 = arith.constant 6 : index
    %c0_33 = arith.constant 0 : index
    %c0_34 = arith.constant 0 : index
    %41 = vector.load %arg2[%c6, %c0_33, %c0_34] : memref<9x8x4xf32, #tpu.memory_space<vmem>>, vector<1x8x4xf32>
    %42 = vector.shape_cast %41 : vector<1x8x4xf32> to vector<8x4xf32>
    %cst_35 = arith.constant dense<0.000000e+00> : vector<8x384xf32>
    %43 = tpu.matmul %42, %40, %cst_35 {dimension_numbers = #tpu.dot_dimension_numbers<[1], [0], [0], [1], [0, 0, 1, 1], [], []>} : vector<8x4xf32>, vector<4x384xf32>, vector<8x384xf32> -> vector<8x384xf32>
    %44 = arith.addf %38, %43 : vector<8x384xf32>
    %c0_36 = arith.constant 0 : index
    %c0_37 = arith.constant 0 : index
    %c146 = arith.constant 146 : index
    %45 = vector.load %arg1[%c0_36, %c0_37, %c146] : memref<1x4x640xf32, #tpu.memory_space<vmem>>, vector<1x4x384xf32>
    %46 = vector.shape_cast %45 : vector<1x4x384xf32> to vector<4x384xf32>
    %c7 = arith.constant 7 : index
    %c0_38 = arith.constant 0 : index
    %c0_39 = arith.constant 0 : index
    %47 = vector.load %arg2[%c7, %c0_38, %c0_39] : memref<9x8x4xf32, #tpu.memory_space<vmem>>, vector<1x8x4xf32>
    %48 = vector.shape_cast %47 : vector<1x8x4xf32> to vector<8x4xf32>
    %cst_40 = arith.constant dense<0.000000e+00> : vector<8x384xf32>
    %49 = tpu.matmul %48, %46, %cst_40 {dimension_numbers = #tpu.dot_dimension_numbers<[1], [0], [0], [1], [0, 0, 1, 1], [], []>} : vector<8x4xf32>, vector<4x384xf32>, vector<8x384xf32> -> vector<8x384xf32>
    %50 = arith.addf %44, %49 : vector<8x384xf32>
    %c0_41 = arith.constant 0 : index
    %c0_42 = arith.constant 0 : index
    %c147 = arith.constant 147 : index
    %51 = vector.load %arg1[%c0_41, %c0_42, %c147] : memref<1x4x640xf32, #tpu.memory_space<vmem>>, vector<1x4x384xf32>
    %52 = vector.shape_cast %51 : vector<1x4x384xf32> to vector<4x384xf32>
    %c8 = arith.constant 8 : index
    %c0_43 = arith.constant 0 : index
    %c0_44 = arith.constant 0 : index
    %53 = vector.load %arg2[%c8, %c0_43, %c0_44] : memref<9x8x4xf32, #tpu.memory_space<vmem>>, vector<1x8x4xf32>
    %54 = vector.shape_cast %53 : vector<1x8x4xf32> to vector<8x4xf32>
    %cst_45 = arith.constant dense<0.000000e+00> : vector<8x384xf32>
    %55 = tpu.matmul %54, %52, %cst_45 {dimension_numbers = #tpu.dot_dimension_numbers<[1], [0], [0], [1], [0, 0, 1, 1], [], []>} : vector<8x4xf32>, vector<4x384xf32>, vector<8x384xf32> -> vector<8x384xf32>
    %56 = arith.addf %50, %55 : vector<8x384xf32>
    %cst_46 = arith.constant 0.000000e+00 : f32
    %57 = vector.broadcast %cst_46 : f32 to vector<8x384xf32>
    %58 = arith.maximumf %56, %57 : vector<8x384xf32>
    %cst_47 = arith.constant 0.000000e+00 : f32
    %59 = vector.broadcast %cst_47 : f32 to vector<8x128xf32>
    %c0_48 = arith.constant 0 : index
    %c0_49 = arith.constant 0 : index
    %60 = vector.load %arg8[%c0_48, %c0_49] : memref<8x640xf32, #tpu.memory_space<vmem>>, vector<8x128xf32>
    tpu.vector_store %arg8[%c0_48, %c0_49], %59 {strides = array<i32>} : memref<8x640xf32, #tpu.memory_space<vmem>>, vector<8x128xf32>,
    %c0_50 = arith.constant 0 : index
    %c0_51 = arith.constant 0 : index
    %61 = vector.load %arg6[%c0_50, %c0_51] : memref<1x384xf32, #tpu.memory_space<vmem>>, vector<1x384xf32>
    %62 = vector.broadcast %61 : vector<1x384xf32> to vector<8x384xf32>
    %63 = arith.mulf %58, %62 : vector<8x384xf32>
    %c0_52 = arith.constant 0 : index
    %c128_53 = arith.constant 128 : index
    %64 = vector.load %arg8[%c0_52, %c128_53] : memref<8x640xf32, #tpu.memory_space<vmem>>, vector<8x384xf32>
    tpu.vector_store %arg8[%c0_52, %c128_53], %63 {strides = array<i32>} : memref<8x640xf32, #tpu.memory_space<vmem>>, vector<8x384xf32>,
    %cst_54 = arith.constant 0.000000e+00 : f32
    %65 = vector.broadcast %cst_54 : f32 to vector<8x128xf32>
    %c0_55 = arith.constant 0 : index
    %c512 = arith.constant 512 : index
    %66 = vector.load %arg8[%c0_55, %c512] : memref<8x640xf32, #tpu.memory_space<vmem>>, vector<8x128xf32>
    tpu.vector_store %arg8[%c0_55, %c512], %65 {strides = array<i32>} : memref<8x640xf32, #tpu.memory_space<vmem>>, vector<8x128xf32>,
    %c0_56 = arith.constant 0 : index
    %c0_57 = arith.constant 0 : index
    %67 = vector.load %arg5[%c0_56, %c0_57] : memref<16x1xf32, #tpu.memory_space<vmem>>, vector<16x1xf32>
    %68 = vector.shape_cast %67 : vector<16x1xf32> to vector<16x1xf32>
    %69 = vector.broadcast %68 : vector<16x1xf32> to vector<16x384xf32>
    %c0_58 = arith.constant 0 : index
    %c109_59 = arith.constant 109 : index
    %70 = vector.load %arg8[%c0_58, %c109_59] : memref<8x640xf32, #tpu.memory_space<vmem>>, vector<8x384xf32>
    %c0_60 = arith.constant 0 : index
    %c0_61 = arith.constant 0 : index
    %c0_62 = arith.constant 0 : index
    %71 = vector.load %arg4[%c0_60, %c0_61, %c0_62] : memref<9x16x8xf32, #tpu.memory_space<vmem>>, vector<1x16x8xf32>
    %72 = vector.shape_cast %71 : vector<1x16x8xf32> to vector<16x8xf32>
    %cst_63 = arith.constant dense<0.000000e+00> : vector<16x384xf32>
    %73 = tpu.matmul %72, %70, %cst_63 {dimension_numbers = #tpu.dot_dimension_numbers<[1], [0], [0], [1], [0, 0, 1, 1], [], []>} : vector<16x8xf32>, vector<8x384xf32>, vector<16x384xf32> -> vector<16x384xf32>
    %74 = arith.addf %69, %73 : vector<16x384xf32>
    %c0_64 = arith.constant 0 : index
    %c110_65 = arith.constant 110 : index
    %75 = vector.load %arg8[%c0_64, %c110_65] : memref<8x640xf32, #tpu.memory_space<vmem>>, vector<8x384xf32>
    %c1_66 = arith.constant 1 : index
    %c0_67 = arith.constant 0 : index
    %c0_68 = arith.constant 0 : index
    %76 = vector.load %arg4[%c1_66, %c0_67, %c0_68] : memref<9x16x8xf32, #tpu.memory_space<vmem>>, vector<1x16x8xf32>
    %77 = vector.shape_cast %76 : vector<1x16x8xf32> to vector<16x8xf32>
    %cst_69 = arith.constant dense<0.000000e+00> : vector<16x384xf32>
    %78 = tpu.matmul %77, %75, %cst_69 {dimension_numbers = #tpu.dot_dimension_numbers<[1], [0], [0], [1], [0, 0, 1, 1], [], []>} : vector<16x8xf32>, vector<8x384xf32>, vector<16x384xf32> -> vector<16x384xf32>
    %79 = arith.addf %74, %78 : vector<16x384xf32>
    %c0_70 = arith.constant 0 : index
    %c111_71 = arith.constant 111 : index
    %80 = vector.load %arg8[%c0_70, %c111_71] : memref<8x640xf32, #tpu.memory_space<vmem>>, vector<8x384xf32>
    %c2_72 = arith.constant 2 : index
    %c0_73 = arith.constant 0 : index
    %c0_74 = arith.constant 0 : index
    %81 = vector.load %arg4[%c2_72, %c0_73, %c0_74] : memref<9x16x8xf32, #tpu.memory_space<vmem>>, vector<1x16x8xf32>
    %82 = vector.shape_cast %81 : vector<1x16x8xf32> to vector<16x8xf32>
    %cst_75 = arith.constant dense<0.000000e+00> : vector<16x384xf32>
    %83 = tpu.matmul %82, %80, %cst_75 {dimension_numbers = #tpu.dot_dimension_numbers<[1], [0], [0], [1], [0, 0, 1, 1], [], []>} : vector<16x8xf32>, vector<8x384xf32>, vector<16x384xf32> -> vector<16x384xf32>
    %84 = arith.addf %79, %83 : vector<16x384xf32>
    %c0_76 = arith.constant 0 : index
    %c127_77 = arith.constant 127 : index
    %85 = vector.load %arg8[%c0_76, %c127_77] : memref<8x640xf32, #tpu.memory_space<vmem>>, vector<8x384xf32>
    %c3_78 = arith.constant 3 : index
    %c0_79 = arith.constant 0 : index
    %c0_80 = arith.constant 0 : index
    %86 = vector.load %arg4[%c3_78, %c0_79, %c0_80] : memref<9x16x8xf32, #tpu.memory_space<vmem>>, vector<1x16x8xf32>
    %87 = vector.shape_cast %86 : vector<1x16x8xf32> to vector<16x8xf32>
    %cst_81 = arith.constant dense<0.000000e+00> : vector<16x384xf32>
    %88 = tpu.matmul %87, %85, %cst_81 {dimension_numbers = #tpu.dot_dimension_numbers<[1], [0], [0], [1], [0, 0, 1, 1], [], []>} : vector<16x8xf32>, vector<8x384xf32>, vector<16x384xf32> -> vector<16x384xf32>
    %89 = arith.addf %84, %88 : vector<16x384xf32>
    %c0_82 = arith.constant 0 : index
    %c128_83 = arith.constant 128 : index
    %90 = vector.load %arg8[%c0_82, %c128_83] : memref<8x640xf32, #tpu.memory_space<vmem>>, vector<8x384xf32>
    %c4_84 = arith.constant 4 : index
    %c0_85 = arith.constant 0 : index
    %c0_86 = arith.constant 0 : index
    %91 = vector.load %arg4[%c4_84, %c0_85, %c0_86] : memref<9x16x8xf32, #tpu.memory_space<vmem>>, vector<1x16x8xf32>
    %92 = vector.shape_cast %91 : vector<1x16x8xf32> to vector<16x8xf32>
    %cst_87 = arith.constant dense<0.000000e+00> : vector<16x384xf32>
    %93 = tpu.matmul %92, %90, %cst_87 {dimension_numbers = #tpu.dot_dimension_numbers<[1], [0], [0], [1], [0, 0, 1, 1], [], []>} : vector<16x8xf32>, vector<8x384xf32>, vector<16x384xf32> -> vector<16x384xf32>
    %94 = arith.addf %89, %93 : vector<16x384xf32>
    %c0_88 = arith.constant 0 : index
    %c129_89 = arith.constant 129 : index
    %95 = vector.load %arg8[%c0_88, %c129_89] : memref<8x640xf32, #tpu.memory_space<vmem>>, vector<8x384xf32>
    %c5_90 = arith.constant 5 : index
    %c0_91 = arith.constant 0 : index
    %c0_92 = arith.constant 0 : index
    %96 = vector.load %arg4[%c5_90, %c0_91, %c0_92] : memref<9x16x8xf32, #tpu.memory_space<vmem>>, vector<1x16x8xf32>
    %97 = vector.shape_cast %96 : vector<1x16x8xf32> to vector<16x8xf32>
    %cst_93 = arith.constant dense<0.000000e+00> : vector<16x384xf32>
    %98 = tpu.matmul %97, %95, %cst_93 {dimension_numbers = #tpu.dot_dimension_numbers<[1], [0], [0], [1], [0, 0, 1, 1], [], []>} : vector<16x8xf32>, vector<8x384xf32>, vector<16x384xf32> -> vector<16x384xf32>
    %99 = arith.addf %94, %98 : vector<16x384xf32>
    %c0_94 = arith.constant 0 : index
    %c145_95 = arith.constant 145 : index
    %100 = vector.load %arg8[%c0_94, %c145_95] : memref<8x640xf32, #tpu.memory_space<vmem>>, vector<8x384xf32>
    %c6_96 = arith.constant 6 : index
    %c0_97 = arith.constant 0 : index
    %c0_98 = arith.constant 0 : index
    %101 = vector.load %arg4[%c6_96, %c0_97, %c0_98] : memref<9x16x8xf32, #tpu.memory_space<vmem>>, vector<1x16x8xf32>
    %102 = vector.shape_cast %101 : vector<1x16x8xf32> to vector<16x8xf32>
    %cst_99 = arith.constant dense<0.000000e+00> : vector<16x384xf32>
    %103 = tpu.matmul %102, %100, %cst_99 {dimension_numbers = #tpu.dot_dimension_numbers<[1], [0], [0], [1], [0, 0, 1, 1], [], []>} : vector<16x8xf32>, vector<8x384xf32>, vector<16x384xf32> -> vector<16x384xf32>
    %104 = arith.addf %99, %103 : vector<16x384xf32>
    %c0_100 = arith.constant 0 : index
    %c146_101 = arith.constant 146 : index
    %105 = vector.load %arg8[%c0_100, %c146_101] : memref<8x640xf32, #tpu.memory_space<vmem>>, vector<8x384xf32>
    %c7_102 = arith.constant 7 : index
    %c0_103 = arith.constant 0 : index
    %c0_104 = arith.constant 0 : index
    %106 = vector.load %arg4[%c7_102, %c0_103, %c0_104] : memref<9x16x8xf32, #tpu.memory_space<vmem>>, vector<1x16x8xf32>
    %107 = vector.shape_cast %106 : vector<1x16x8xf32> to vector<16x8xf32>
    %cst_105 = arith.constant dense<0.000000e+00> : vector<16x384xf32>
    %108 = tpu.matmul %107, %105, %cst_105 {dimension_numbers = #tpu.dot_dimension_numbers<[1], [0], [0], [1], [0, 0, 1, 1], [], []>} : vector<16x8xf32>, vector<8x384xf32>, vector<16x384xf32> -> vector<16x384xf32>
    %109 = arith.addf %104, %108 : vector<16x384xf32>
    %c0_106 = arith.constant 0 : index
    %c147_107 = arith.constant 147 : index
    %110 = vector.load %arg8[%c0_106, %c147_107] : memref<8x640xf32, #tpu.memory_space<vmem>>, vector<8x384xf32>
    %c8_108 = arith.constant 8 : index
    %c0_109 = arith.constant 0 : index
    %c0_110 = arith.constant 0 : index
    %111 = vector.load %arg4[%c8_108, %c0_109, %c0_110] : memref<9x16x8xf32, #tpu.memory_space<vmem>>, vector<1x16x8xf32>
    %112 = vector.shape_cast %111 : vector<1x16x8xf32> to vector<16x8xf32>
    %cst_111 = arith.constant dense<0.000000e+00> : vector<16x384xf32>
    %113 = tpu.matmul %112, %110, %cst_111 {dimension_numbers = #tpu.dot_dimension_numbers<[1], [0], [0], [1], [0, 0, 1, 1], [], []>} : vector<16x8xf32>, vector<8x384xf32>, vector<16x384xf32> -> vector<16x384xf32>
    %114 = arith.addf %109, %113 : vector<16x384xf32>
    %cst_112 = arith.constant 0.000000e+00 : f32
    %115 = vector.broadcast %cst_112 : f32 to vector<16x384xf32>
    %116 = arith.maximumf %114, %115 : vector<16x384xf32>
    %c0_113 = arith.constant 0 : index
    %c0_114 = arith.constant 0 : index
    %c0_115 = arith.constant 0 : index
    %117 = vector.load %arg7[%c0_113, %c0_114, %c0_115] : memref<1x16x384xf32, #tpu.memory_space<vmem>>, vector<1x16x384xf32>
    %118 = vector.shape_cast %117 : vector<1x16x384xf32> to vector<16x384xf32>
    %119 = vector.shape_cast %116 : vector<16x384xf32> to vector<1x16x384xf32>
    tpu.vector_store %arg7[%c0_113, %c0_114, %c0_115], %119 {strides = array<i32>} : memref<1x16x384xf32, #tpu.memory_space<vmem>>, vector<1x16x384xf32>,
    return
  }
  func.func @transform_0(%arg0: i32) -> (i32, i32, i32) {
    %c0_i32 = arith.constant 0 : i32
    %c0_i32_0 = arith.constant 0 : i32
    %c0_i32_1 = arith.constant 0 : i32
    return %arg0, %c0_i32, %c0_i32_0 : i32, i32, i32
  }
  func.func @transform_1(%arg0: i32) -> (i32, i32, i32) {
    %c0_i32 = arith.constant 0 : i32
    %c0_i32_0 = arith.constant 0 : i32
    %c0_i32_1 = arith.constant 0 : i32
    %c0_i32_2 = arith.constant 0 : i32
    return %c0_i32, %c0_i32_0, %c0_i32_1 : i32, i32, i32
  }
  func.func @transform_2(%arg0: i32) -> (i32, i32) {
    %c0_i32 = arith.constant 0 : i32
    %c0_i32_0 = arith.constant 0 : i32
    %c0_i32_1 = arith.constant 0 : i32
    return %c0_i32, %c0_i32_0 : i32, i32
  }
  func.func @transform_3(%arg0: i32) -> (i32, i32, i32) {
    %c0_i32 = arith.constant 0 : i32
    %c0_i32_0 = arith.constant 0 : i32
    %c0_i32_1 = arith.constant 0 : i32
    %c0_i32_2 = arith.constant 0 : i32
    return %c0_i32, %c0_i32_0, %c0_i32_1 : i32, i32, i32
  }
  func.func @transform_4(%arg0: i32) -> (i32, i32) {
    %c0_i32 = arith.constant 0 : i32
    %c0_i32_0 = arith.constant 0 : i32
    %c0_i32_1 = arith.constant 0 : i32
    return %c0_i32, %c0_i32_0 : i32, i32
  }
  func.func @transform_5(%arg0: i32) -> (i32, i32) {
    %c0_i32 = arith.constant 0 : i32
    %c0_i32_0 = arith.constant 0 : i32
    %c0_i32_1 = arith.constant 0 : i32
    return %c0_i32, %c0_i32_0 : i32, i32
  }
  func.func @transform_6(%arg0: i32) -> (i32, i32, i32) {
    %c0_i32 = arith.constant 0 : i32
    %c0_i32_0 = arith.constant 0 : i32
    %c0_i32_1 = arith.constant 0 : i32
    return %arg0, %c0_i32, %c0_i32_0 : i32, i32, i32
  }
}

</mosaic_0001>

<bundles_post_ra>
// kernel: _lambda_.1
= control target key start
LH: loop header
LB: loop body
LE: loop exit
PB: predicated region body
PF: predicated region fallthrough
CT: control target
= control target key end

     0   :  { %s3960_s21 = smov 0   ;;  %s4386_s0 = inlined_call_operand.vmem [shape: f32[2,4,640], index: 0, kind: input, shape index: {}]   ;;  %s4387_s1 = inlined_call_operand.vmem [shape: f32[9,8,4], index: 1, kind: input, shape index: {}]   ;;  %s4388_s2 = inlined_call_operand.vmem [shape: f32[8,1], index: 2, kind: input, shape index: {}]   ;;  %s4389_s3 = inlined_call_operand.vmem [shape: f32[9,16,8], index: 3, kind: input, shape index: {}]   ;;  %s4390_s4 = inlined_call_operand.vmem [shape: f32[16,1], index: 4, kind: input, shape index: {}]   ;;  %s4391_s5 = inlined_call_operand.vmem [shape: f32[1,384], index: 5, kind: input, shape index: {}]   ;;  %s4392_s6 = inlined_call_operand.vmem [shape: f32[2,16,384], index: 6, kind: output, shape index: {}]  }
   0x1 LB: > { %s3541_s22 = sadd.s32 4294967295, %s3912_s21   ;;  %p3545_p0 = scmp.ge.s32.totalorder %s3912_s21, 1  ;;  %s3912_s21 = sphi %s3960_s21, %s16_s21  }
   0x2   : > { %p212_p1 = scmp.lt.s32.totalorder %s3912_s21, 3 }
   0x4   : > { %p213_p2 = pnand %p3545_p0, %p212_p1 }
   0x5   : > { %p242_p3 = scmp.lt.s32.totalorder (!%p213_p2), %s3541_s22, 1  ;;  %v3914_v0 = vmov (!%p213_p2), 0.0   ;;  %s3915_s27 = smov (!%p213_p2), 19   ;;  %vm3916_vm0 = vmmov (!%p213_p2), 0   ;;  %v252_v9 = vld [vmem:[%s4388_s2] sm:$0xff] (!%p213_p2)  ;;  %v3924_v10 = vmov (!%p213_p2), 0  }
   0x6   : > { %216 = sbr.rel (%p213_p2) target bundleno = 840 (0x348), region = 44  ;;  %352 = vmatprep.mubr.f32.mxu0 (!%p213_p2), %v3914_v0  ;;  %3700 = vmatprep.subr.mxu1 (!%p213_p2), %v3914_v0  ;;  %s3917_s28 = smov (!%p213_p2), 18   ;;  %vm273_vm1 = vcmask (!%p213_p2), 154624   ;;  %vm281_vm2 = vcmask (!%p213_p2), 1043456   ;;  %vm448_vm3 = vcmask (!%p213_p2), 146432   ;;  %v260_v16 = vld [vmem:[%s4387_s1] sm:$0xff] (!%p213_p2) }
   0x7   : > { %3702 = vmatprep.mubr.msk.f32.mxu1 (!%p213_p2), %vm3916_vm0, %v3914_v0  ;;  %s3918_s29 = smov (!%p213_p2), 17   ;;  %s3919_s30 = smov (!%p213_p2), 1   ;;  %3900 = vset.pattern.permute.xlu0 (!%p213_p2), %v3924_v10  ;;  %vm277_vm4 = vcmask (!%p213_p2), 31744   ;;  %vm621_vm5 = vcmask (!%p213_p2), 138240   ;;  %v3553_v25 = vld [vmem:[%s4387_s1 + $0x8] sm:$0xff] (!%p213_p2)  ;;  %vm794_vm6 = vcmask (!%p213_p2), 7168  }
   0x8   : > { %s3920_s7 = smov (!%p213_p2), 127   ;;  %s3921_s8 = smov (!%p213_p2), 111   ;;  %3901 = vset.pattern.permute.xlu1 (!%p213_p2), %v3924_v10  ;;  %v3559_v33 = vld [vmem:[%s4387_s1 + $0x10] sm:$0xff] (!%p213_p2)  ;;  %v3565_v41 = vld [vmem:[%s4387_s1 + $0x18] sm:$0xff] (!%p213_p2)  ;;  %vm1127_vm7 = vcmask (!%p213_p2), 1039360   ;;  %v3571_v48 = vld [vmem:[%s4387_s1 + $0x20] sm:$0xff] (!%p213_p2) }
   0x9   : > { %s3922_s9 = smov (!%p213_p2), 110   ;;  %s3923_s10 = smov (!%p213_p2), 109   ;;  %vm1300_vm8 = vcmask (!%p213_p2), 908288   ;;  %v3577_v57 = vld [vmem:[%s4387_s1 + $0x28] sm:$0xff] (!%p213_p2)  ;;  %vm1473_vm9 = vcmask (!%p213_p2), 900096   ;;  %vm1646_vm10 = vcmask (!%p213_p2), 891904  }
   0xa   : > { %vm1867_vm11 = vcmask (!%p213_p2), 64512  }
   0xd   : > { %s4394_s22 = smov (!%p242_p3, %s3541_s22), 1 }
   0xe   : > { %s3879_s23 = smul.u32 20, %s4394_s22 }
   0xf   : > { %s3880_s15 = smul.u32 48, %s4394_s22 }
  0x10   : > { %s3976_s26 = scalar_lea.vmem %s4386_s0, %s3879_s23 }
  0x11   : > { %v258_v1 = vld [vmem:[%s3976_s26] sm:$0xff]  ;;  %v259_v3 = vld [vmem:[%s3976_s26 + $0x8] sm:$0xff]  ;;  %s251_s18 = scalar_lea.vmem %s4392_s6, %s3880_s15 }
  0x12   : > { %265 = vrot.lane.b32.xlu1 %v258_v1, %s3915_s27  ;;  %v263_v2 = vcombine.high %v258_v1, %v258_v1  ;;  %v264_v4 = vcombine.high %v259_v3, %v259_v3  ;;  %v3997_v5 = vld [vmem:[%s3976_s26 + $0x4] sm:$0xff]  ;;  %v1112_v6 = vld [vmem:[%s3976_s26 + $0xc] sm:$0xff] }
  0x13   : > { %v4004_v7 = vcombine.high %v3997_v5, %v3997_v5  ;;  %v1118_v8 = vcombine.high %v1112_v6, %v1112_v6  ;;  %v952_v49 = vld [vmem:[%s3976_s26 + $0xc] sm:$0xf] }
  0x14   : > { %267 = vrot.lane.b32.xlu0 %v263_v2, %s3915_s27 }
  0x16   : > { %442 = vrot.lane.b32.xlu1 %v263_v2, %s3917_s28 }
  0x18   : > { %269 = vrot.lane.b32.xlu0 %v259_v3, %s3915_s27 }
  0x1a   : > { %440 = vrot.lane.b32.xlu1 %v258_v1, %s3917_s28 }
  0x1c   : > { %444 = vrot.lane.b32.xlu0 %v259_v3, %s3917_s28 }
  0x1e   : > { %615 = vrot.lane.b32.xlu1 %v263_v2, %s3918_s29 }
  0x20   : > { %271 = vrot.lane.b32.xlu0 %v264_v4, %s3915_s27 }
  0x22   : > { %613 = vrot.lane.b32.xlu1 %v258_v1, %s3918_s29 }
  0x24   : > { %617 = vrot.lane.b32.xlu0 %v259_v3, %s3918_s29 }
  0x26   : > { %788 = vrot.lane.b32.xlu1 %v263_v2, %s3919_s30  ;;  %v3583_v2 = vld [vmem:[%s4387_s1 + $0x30] sm:$0xff] }
  0x28   : > { %446 = vrot.lane.b32.xlu0 %v264_v4, %s3917_s28 }
  0x2a   : > { %786 = vrot.lane.b32.xlu1 %v258_v1, %s3919_s30 }
  0x2c   : > { %790 = vrot.lane.b32.xlu0 %v259_v3, %s3919_s30 }
  0x2e   : > { %792 = vrot.lane.b32.xlu1 %v264_v4, %s3919_s30 }
  0x30   : > { %619 = vrot.lane.b32.xlu0 %v264_v4, %s3918_s29 }
  0x32   : > { %1123 = vrot.lane.b32.xlu1 %v1112_v6, %s3920_s7 }
  0x34   : > { %1121 = vrot.lane.b32.xlu0 %v4004_v7, %s3920_s7 }
  0x36   : > { %1294 = vrot.lane.b32.xlu1 %v4004_v7, %s3921_s8 }
  0x38   : > { %1119 = vrot.lane.b32.xlu0 %v3997_v5, %s3920_s7 }
  0x3a   : > { %1292 = vrot.lane.b32.xlu1 %v3997_v5, %s3921_s8 }
  0x3c   : > { %1296 = vrot.lane.b32.xlu0 %v1112_v6, %s3921_s8 }
  0x3e   : > { %1467 = vrot.lane.b32.xlu1 %v4004_v7, %s3922_s9 }
  0x40   : > { %1125 = vrot.lane.b32.xlu0 %v1118_v8, %s3920_s7 }
  0x42   : > { %1465 = vrot.lane.b32.xlu1 %v3997_v5, %s3922_s9 }
  0x44   : > { %1469 = vrot.lane.b32.xlu0 %v1112_v6, %s3922_s9 }
  0x46   : > { %1640 = vrot.lane.b32.xlu1 %v4004_v7, %s3923_s10 }
  0x48   : > { %1298 = vrot.lane.b32.xlu0 %v1118_v8, %s3921_s8 }
  0x4a   : > { %1638 = vrot.lane.b32.xlu1 %v3997_v5, %s3923_s10 }
  0x4c   : > { %1642 = vrot.lane.b32.xlu0 %v1112_v6, %s3923_s10 }
  0x4e   : > { %1644 = vrot.lane.b32.xlu1 %v1118_v8, %s3923_s10 }
  0x50   : > { %1471 = vrot.lane.b32.xlu0 %v1118_v8, %s3922_s9 }
  0x54   : > { %255 = vperm.xlu0 %3900, %v252_v9   ;;  %v3589_v9 = vld [vmem:[%s4387_s1 + $0x38] sm:$0xff] }
  0x58   : > { %1853 = vrot.lane.b32.xlu0 %v3914_v0, %s3915_s27 }
  0x84   : > { %v266_v11 = vpop.permute.xlu1 %265 }
  0x86   : > { %v268_v12 = vpop.permute.xlu0 %267 }
  0x87   : > { %v274_v18 = vsel %vm273_vm1, %v266_v11, %v268_v12 }
  0x88   : > { %v443_v13 = vpop.permute.xlu1 %442 }
  0x8a   : > { %v270_v14 = vpop.permute.xlu0 %269 }
  0x8b   : > { %v275_v15 = vsel %vm273_vm1, %v268_v12, %v270_v14 }
  0x8c   : > { %v441_v17 = vpop.permute.xlu1 %440  ;;  %3548 = vmatprep.subr.msk.mxu0 %vm281_vm2, %v275_v15 }
  0x8d   : > { %3549 = vmatpush1.msk.msra.mxu0 %vm281_vm2, %v274_v18  ;;  %v449_v19 = vsel %vm448_vm3, %v441_v17, %v443_v13  ;;  %v1807_v17 = vld [vmem:[%s4391_s5] sm:$0x7] }
  0x8e   : > { %3550 = vmatmul.mubr.msk.f32.vlgmr.msra.gmra.mrb[0].mxu0 %vm277_vm4, %v260_v16  ;;  %v445_v20 = vpop.permute.xlu0 %444 }
  0x8f   : > { %v450_v21 = vsel %vm448_vm3, %v443_v13, %v445_v20  ;;  %525 = vmatprep.mubr.f32.mxu0 %v3914_v0  ;;  %v3595_v13 = vld [vmem:[%s4387_s1 + $0x40] sm:$0xff] }
  0x90   : > { %v616_v22 = vpop.permute.xlu1 %615  ;;  %3554 = vmatprep.subr.msk.mxu0 %vm281_vm2, %v450_v21 }
  0x91   : > { %3555 = vmatpush1.msk.msra.mxu0 %vm281_vm2, %v449_v19 }
  0x92   : > { %v272_v23 = vpop.permute.xlu0 %271 }
  0x93   : > { %v276_v24 = vsel %vm273_vm1, %v270_v14, %v272_v23  ;;  %v1809_v14 = vlaneseq }
  0x94   : > { %v614_v26 = vpop.permute.xlu1 %613  ;;  %3701 = vmatpush3.msk.msra.mxu1 %vm281_vm2, %v276_v24 }
  0x95   : > { %3703 = vmatmul.mubr.msk.f32.vlgmr.msra.gmra.mrb[0].mxu1 %vm277_vm4, %v260_v16  ;;  %3705 = vmatprep.subr.mxu1 %v3914_v0  ;;  %v622_v27 = vsel %vm621_vm5, %v614_v26, %v616_v22  ;;  %v1810_v15 = vshrl.u32 %v1809_v14, 7  ;;  %v3618_v14 = vld [vmem:[%s4389_s3 + $0x38] sm:$0xff] }
  0x96   : > { %3556 = vmatmul.mubr.msk.f32.vlgmr.msra.gmra.mrb[0].mxu0 %vm277_vm4, %v3553_v25  ;;  %v618_v28 = vpop.permute.xlu0 %617  ;;  %3707 = vmatprep.mubr.msk.f32.mxu1 %vm3916_vm0, %v3914_v0 }
  0x97   : > { %v623_v29 = vsel %vm621_vm5, %v616_v22, %v618_v28  ;;  %698 = vmatprep.mubr.f32.mxu0 %v3914_v0  ;;  %v1811_v16 = vsub.s32 0, %v1810_v15  ;;  %v1815_v23 = vsub.s32 1, %v1810_v15  ;;  %v1819_v26 = vsub.s32 2, %v1810_v15 }
  0x98   : > { %v789_v30 = vpop.permute.xlu1 %788  ;;  %3560 = vmatprep.subr.msk.mxu0 %vm281_vm2, %v623_v29 }
  0x99   : > { %3561 = vmatpush1.msk.msra.mxu0 %vm281_vm2, %v622_v27  ;;  %v1816_v29 = vrot.slane %v1807_v17, %v1815_v23 }
  0x9a   : > { %v447_v31 = vpop.permute.xlu0 %446 }
  0x9b   : > { %v451_v32 = vsel %vm448_vm3, %v445_v20, %v447_v31  ;;  %v1812_v20 = vrot.slane %v1807_v17, %v1811_v16 }
  0x9c   : > { %v787_v34 = vpop.permute.xlu1 %786  ;;  %3706 = vmatpush3.msk.msra.mxu1 %vm281_vm2, %v451_v32  ;;  %v1820_v32 = vrot.slane %v1807_v17, %v1819_v26  ;;  %v3629_v26 = vld [vmem:[%s4389_s3 + $0x50] sm:$0xff] }
  0x9d   : > { %3708 = vmatmul.mubr.msk.f32.vlgmr.msra.gmra.mrb[0].mxu1 %vm277_vm4, %v3553_v25  ;;  %3710 = vmatprep.subr.mxu1 %v3914_v0  ;;  %v795_v35 = vsel %vm794_vm6, %v787_v34, %v789_v30 }
  0x9e   : > { %3562 = vmatmul.mubr.msk.f32.vlgmr.msra.gmra.mrb[0].mxu0 %vm277_vm4, %v3559_v33  ;;  %v791_v36 = vpop.permute.xlu0 %790  ;;  %3712 = vmatprep.mubr.msk.f32.mxu1 %vm3916_vm0, %v3914_v0 }
  0x9f   : > { %v796_v37 = vsel %vm794_vm6, %v789_v30, %v791_v36  ;;  %871 = vmatprep.mubr.f32.mxu0 %v3914_v0 }
  0xa0   : > { %v793_v38 = vpop.permute.xlu1 %792  ;;  %3566 = vmatprep.subr.msk.mxu0 %vm281_vm2, %v796_v37  ;;  %v1831_v37 = vld [vmem:[%s4390_s4] sm:$0xff] }
  0xa1   : > { %3567 = vmatpush1.msk.msra.mxu0 %vm281_vm2, %v795_v35  ;;  %v797_v43 = vsel %vm794_vm6, %v791_v36, %v793_v38  ;;  %v1832_v38 = vld [vmem:[%s4390_s4 + $0x8] sm:$0xff] }
  0xa2   : > { %v620_v39 = vpop.permute.xlu0 %619  ;;  %3572 = vmatprep.subr.msk.mxu0 %vm281_vm2, %v4004_v7 }
  0xa3   : > { %v624_v40 = vsel %vm621_vm5, %v618_v28, %v620_v39 }
  0xa4   : > { %3711 = vmatpush3.msk.msra.mxu1 %vm281_vm2, %v624_v40  ;;  %v1124_v42 = vpop.permute.xlu1 %1123 }
  0xa5   : > { %3713 = vmatmul.mubr.msk.f32.vlgmr.msra.gmra.mrb[0].mxu1 %vm277_vm4, %v3559_v33  ;;  %3715 = vmatprep.subr.mxu1 %v3914_v0 }
  0xa6   : > { %3568 = vmatmul.mubr.msk.f32.vlgmr.msra.gmra.mrb[0].mxu0 %vm277_vm4, %v3565_v41  ;;  %3716 = vmatpush3.msk.msra.mxu1 %vm281_vm2, %v797_v43  ;;  %v1122_v44 = vpop.permute.xlu0 %1121 }
  0xa7   : > { %3573 = vmatpush1.msk.msra.mxu0 %vm281_vm2, %v3997_v5  ;;  %v1129_v45 = vsel %vm1127_vm7, %v1122_v44, %v1124_v42  ;;  %3717 = vmatprep.mubr.msk.f32.mxu1 %vm3916_vm0, %v3914_v0 }
  0xa8   : > { %1031 = vmatprep.mubr.f32.mxu0 %v3914_v0  ;;  %3578 = vmatprep.subr.msk.mxu0 %vm281_vm2, %v1129_v45  ;;  %v1295_v46 = vpop.permute.xlu1 %1294  ;;  %v1847_v45 = vld [vmem:[%s4389_s3] sm:$0xff] }
  0xa9   : > { %3720 = vmatprep.subr.mxu1 %v3914_v0 }
  0xaa   : > { %v1120_v47 = vpop.permute.xlu0 %1119 }
  0xab   : > { %v1128_v50 = vsel %vm1127_vm7, %v1120_v47, %v1122_v44 }
  0xac   : > { %v1293_v51 = vpop.permute.xlu1 %1292 }
  0xad   : > { %3718 = vmatmul.mubr.msk.f32.vlgmr.msra.gmra.mrb[0].mxu1 %vm277_vm4, %v3565_v41  ;;  %v1301_v58 = vsel %vm1300_vm8, %v1293_v51, %v1295_v46 }
  0xae   : > { %3574 = vmatmul.mubr.msk.f32.vlgmr.msra.gmra.mrb[0].mxu0 %vm277_vm4, %v3571_v48  ;;  %v1297_v52 = vpop.permute.xlu0 %1296  ;;  %3721 = vmatpush3.msk.msra.mxu1 %vm281_vm2, %v952_v49 }
  0xaf   : > { %3579 = vmatpush1.msk.msra.mxu0 %vm281_vm2, %v1128_v50  ;;  %v1302_v53 = vsel %vm1300_vm8, %v1295_v46, %v1297_v52  ;;  %3722 = vmatprep.mubr.msk.f32.mxu1 %vm3916_vm0, %v3914_v0  ;;  %v1848_v50 = vld [vmem:[%s4389_s3 + $0x8] sm:$0xff] }
  0xb0   : > { %3725 = vmatprep.subr.mxu1 %v3914_v0  ;;  %1204 = vmatprep.mubr.f32.mxu0 %v3914_v0  ;;  %v1468_v54 = vpop.permute.xlu1 %1467 }
  0xb1   : > { %3584 = vmatprep.subr.msk.mxu0 %vm281_vm2, %v1302_v53 }
  0xb2   : > { %v1126_v55 = vpop.permute.xlu0 %1125 }
  0xb3   : > { %v1130_v56 = vsel %vm1127_vm7, %v1124_v42, %v1126_v55 }
  0xb4   : > { %v1466_v59 = vpop.permute.xlu1 %1465 }
  0xb5   : > { %3723 = vmatmul.mubr.msk.f32.vlgmr.msra.gmra.mrb[0].mxu1 %vm277_vm4, %v3571_v48  ;;  %v1474_v3 = vsel %vm1473_vm9, %v1466_v59, %v1468_v54 }
  0xb6   : > { %3726 = vmatpush3.msk.msra.mxu1 %vm281_vm2, %v1130_v56  ;;  %3580 = vmatmul.mubr.msk.f32.vlgmr.msra.gmra.mrb[0].mxu0 %vm277_vm4, %v3577_v57  ;;  %v1470_v60 = vpop.permute.xlu0 %1469 }
  0xb7   : > { %3585 = vmatpush1.msk.msra.mxu0 %vm281_vm2, %v1301_v58  ;;  %v1475_v61 = vsel %vm1473_vm9, %v1468_v54, %v1470_v60  ;;  %3727 = vmatprep.mubr.msk.f32.mxu1 %vm3916_vm0, %v3914_v0  ;;  %v3605_v58 = vld [vmem:[%s4389_s3 + $0x10] sm:$0xff] }
  0xb8   : > { %3730 = vmatprep.subr.mxu1 %v3914_v0  ;;  %1377 = vmatprep.mubr.f32.mxu0 %v3914_v0  ;;  %v1641_v1 = vpop.permute.xlu1 %1640 }
  0xb9   : > { %3590 = vmatprep.subr.msk.mxu0 %vm281_vm2, %v1475_v61 }
  0xba   : > { %v1299_v62 = vpop.permute.xlu0 %1298 }
  0xbb   : > { %v1303_v63 = vsel %vm1300_vm8, %v1297_v52, %v1299_v62  ;;  %v3606_v62 = vld [vmem:[%s4389_s3 + $0x18] sm:$0xff] }
  0xbc   : > { %v1639_v6 = vpop.permute.xlu1 %1638 }
  0xbd   : > { %3728 = vmatmul.mubr.msk.f32.vlgmr.msra.gmra.mrb[0].mxu1 %vm277_vm4, %v3577_v57  ;;  %v1647_v10 = vsel %vm1646_vm10, %v1639_v6, %v1641_v1 }
  0xbe   : > { %3731 = vmatpush3.msk.msra.mxu1 %vm281_vm2, %v1303_v63  ;;  %3586 = vmatmul.mubr.msk.f32.vlgmr.msra.gmra.mrb[0].mxu0 %vm277_vm4, %v3583_v2  ;;  %v1643_v4 = vpop.permute.xlu0 %1642  ;;  %v3611_v63 = vld [vmem:[%s4389_s3 + $0x20] sm:$0xff] }
  0xbf   : > { %3591 = vmatpush1.msk.msra.mxu0 %vm281_vm2, %v1474_v3  ;;  %v1648_v5 = vsel %vm1646_vm10, %v1641_v1, %v1643_v4  ;;  %3732 = vmatprep.mubr.msk.f32.mxu1 %vm3916_vm0, %v3914_v0 }
  0xc0   : > { %3735 = vmatprep.subr.mxu1 %v3914_v0  ;;  %1550 = vmatprep.mubr.f32.mxu0 %v3914_v0  ;;  %v1645_v11 = vpop.permute.xlu1 %1644 }
  0xc1   : > { %3596 = vmatprep.subr.msk.mxu0 %vm281_vm2, %v1648_v5  ;;  %v1649_v12 = vsel %vm1646_vm10, %v1643_v4, %v1645_v11  ;;  %v3612_v5 = vld [vmem:[%s4389_s3 + $0x28] sm:$0xff] }
  0xc2   : > { %v1472_v7 = vpop.permute.xlu0 %1471 }
  0xc3   : > { %v1476_v8 = vsel %vm1473_vm9, %v1470_v60, %v1472_v7 }
  0xc5   : > { %3733 = vmatmul.mubr.msk.f32.vlgmr.msra.gmra.mrb[0].mxu1 %vm277_vm4, %v3583_v2 }
  0xc6   : > { %3736 = vmatpush3.msk.msra.mxu1 %vm281_vm2, %v1476_v8  ;;  %3592 = vmatmul.mubr.msk.f32.vlgmr.msra.gmra.mrb[0].mxu0 %vm277_vm4, %v3589_v9 }
  0xc7   : > { %3597 = vmatpush1.msk.msra.mxu0 %vm281_vm2, %v1647_v10  ;;  %3737 = vmatprep.mubr.msk.f32.mxu1 %vm3916_vm0, %v3914_v0 }
  0xc8   : > { %3740 = vmatprep.subr.mxu1 %v3914_v0  ;;  %1723 = vmatprep.mubr.f32.mxu0 %v3914_v0 }
  0xcd   : > { %3738 = vmatmul.mubr.msk.f32.vlgmr.msra.gmra.mrb[0].mxu1 %vm277_vm4, %v3589_v9  ;;  %v3617_v9 = vld [vmem:[%s4389_s3 + $0x30] sm:$0xff] }
  0xce   : > { %3741 = vmatpush3.msk.msra.mxu1 %vm281_vm2, %v1649_v12  ;;  %3598 = vmatmul.mubr.msk.f32.vlgmr.msra.gmra.mrb[0].mxu0 %vm277_vm4, %v3595_v13 }
  0xcf   : > { %3742 = vmatprep.mubr.msk.f32.mxu1 %vm3916_vm0, %v3914_v0  ;;  %2300 = vmatprep.mubr.f32.mxu0 %v3914_v0 }
  0xd3   : > { %v256_v18 = vpop.permute.xlu0 %255 }
  0xd5   : > { %3743 = vmatmul.mubr.msk.f32.vlgmr.msra.gmra.mrb[0].mxu1 %vm277_vm4, %v3595_v13 }
  0xd6   : > { %1938 = vmatprep.mubr.f32.mxu1 %v3914_v0 }
  0xd7   : > { %v1854_v39 = vpop.permute.xlu0 %1853 }
 0x1a1   : > { %v1725_v19 = vpop.f32.mrb[0].mxu0 }
 0x1a2   : > { %v3790_v21 = vadd.f32 %v1725_v19, %v256_v18  ;;  %v1727_v22 = vpop.f32.mrb[1].mxu0 }
 0x1a3   : > { %v3791_v24 = vadd.f32 %v1727_v22, %v256_v18 }
 0x1a4   : > { %v1803_v25 = vmax.f32 %v3790_v21, 0.0  ;;  %v3624_v21 = vld [vmem:[%s4389_s3 + $0x48] sm:$0xff] }
 0x1a5   : > { %v1804_v28 = vmax.f32 %v3791_v24, 0.0 }
 0x1a6   : > { %v4171_v27 = vmul.f32 %v1812_v20, %v1803_v25 }
 0x1a7   : > { %v4177_v34 = vmul.f32 %v1816_v29, %v1804_v28 }
 0x1a8   : > { %v1796_v30 = vpop.f32.mrb[0].mxu1  ;;  %2037 = vrot.lane.b32.xlu0 %v4171_v27, %s3917_s28  ;;  %1855 = vrot.lane.b32.xlu1 %v4171_v27, %s3915_s27 }
 0x1a9   : > { %v3792_v31 = vadd.f32 %v1796_v30, %v256_v18  ;;  %v3744_v33 = vpop.f32.mrb[1].mxu1  ;;  %v3623_v18 = vld [vmem:[%s4389_s3 + $0x40] sm:$0xff]  ;;  %v3630_v30 = vld [vmem:[%s4389_s3 + $0x58] sm:$0xff] }
 0x1ab   : > { %v1805_v35 = vmax.f32 %v3792_v31, 0.0 }
 0x1ac   : > { %2035 = vrot.lane.b32.xlu0 %v3914_v0, %s3917_s28  ;;  %1857 = vrot.lane.b32.xlu1 %v4177_v34, %s3915_s27 }
 0x1ad   : > { %v4183_v36 = vmul.f32 %v1820_v32, %v1805_v35 }
 0x1b0   : > { %2218 = vrot.lane.b32.xlu0 %v4171_v27, %s3918_s29  ;;  %1859 = vrot.lane.b32.xlu1 %v4183_v36, %s3915_s27 }
 0x1b4   : > { %2216 = vrot.lane.b32.xlu0 %v3914_v0, %s3918_s29  ;;  %2039 = vrot.lane.b32.xlu1 %v4177_v34, %s3917_s28 }
 0x1b8   : > { %2399 = vrot.lane.b32.xlu0 %v4171_v27, %s3919_s30  ;;  %2041 = vrot.lane.b32.xlu1 %v4183_v36, %s3917_s28 }
 0x1bc   : > { %2397 = vrot.lane.b32.xlu0 %v3914_v0, %s3919_s30  ;;  %2220 = vrot.lane.b32.xlu1 %v4177_v34, %s3918_s29 }
 0x1c0   : > { %2755 = vrot.lane.b32.xlu0 %v4177_v34, %s3920_s7  ;;  %2222 = vrot.lane.b32.xlu1 %v4183_v36, %s3918_s29 }
 0x1c4   : > { %2753 = vrot.lane.b32.xlu0 %v4171_v27, %s3920_s7  ;;  %2401 = vrot.lane.b32.xlu1 %v4177_v34, %s3919_s30 }
 0x1c8   : > { %2936 = vrot.lane.b32.xlu0 %v4177_v34, %s3921_s8  ;;  %2403 = vrot.lane.b32.xlu1 %v4183_v36, %s3919_s30 }
 0x1cc   : > { %2934 = vrot.lane.b32.xlu0 %v4171_v27, %s3921_s8  ;;  %2757 = vrot.lane.b32.xlu1 %v4183_v36, %s3920_s7 }
 0x1d0   : > { %3117 = vrot.lane.b32.xlu0 %v4177_v34, %s3922_s9  ;;  %2759 = vrot.lane.b32.xlu1 %v3914_v0, %s3920_s7 }
 0x1d4   : > { %3115 = vrot.lane.b32.xlu0 %v4171_v27, %s3922_s9  ;;  %2938 = vrot.lane.b32.xlu1 %v4183_v36, %s3921_s8 }
 0x1d8   : > { %3298 = vrot.lane.b32.xlu0 %v4177_v34, %s3923_s10  ;;  %2940 = vrot.lane.b32.xlu1 %v3914_v0, %s3921_s8 }
 0x1dc   : > { %3296 = vrot.lane.b32.xlu0 %v4171_v27, %s3923_s10  ;;  %3119 = vrot.lane.b32.xlu1 %v4183_v36, %s3922_s9 }
 0x1e0   : > { %1835 = vperm.xlu0 %3900, %v1831_v37   ;;  %3121 = vrot.lane.b32.xlu1 %v3914_v0, %s3922_s9 }
 0x1e4   : > { %3300 = vrot.lane.b32.xlu1 %v4183_v36, %s3923_s10 }
 0x1e8   : > { %3302 = vrot.lane.b32.xlu1 %v3914_v0, %s3923_s10 }
 0x1ec   : > { %1840 = vperm.xlu1 %3901, %v1832_v38   ;;  %v3636_v38 = vld [vmem:[%s4389_s3 + $0x68] sm:$0xff] }
 0x21a   : > { %v1856_v40 = vpop.permute.xlu1 %1855  ;;  %v2038_v41 = vpop.permute.xlu0 %2037 }
 0x21b   : > { %v1861_v46 = vsel %vm273_vm1, %v1854_v39, %v1856_v40 }
 0x21e   : > { %v1858_v42 = vpop.permute.xlu1 %1857  ;;  %v2036_v43 = vpop.permute.xlu0 %2035 }
 0x21f   : > { %v1862_v44 = vsel %vm273_vm1, %v1856_v40, %v1858_v42  ;;  %v2043_v54 = vsel %vm448_vm3, %v2036_v43, %v2038_v41  ;;  %v3641_v43 = vld [vmem:[%s4389_s3 + $0x70] sm:$0xff] }
 0x220   : > { %1874 = vmatprep.subr.mxu1 %v1862_v44 }
 0x221   : > { %1875 = vmatpush1.msra.mxu1 %v1861_v46 }
 0x222   : > { %v1860_v47 = vpop.permute.xlu1 %1859  ;;  %3601 = vmatmul.mubr.msk.f32.vlgmr.msra.gmra.mrb[2].mxu1 %vm1867_vm11, %v1847_v45  ;;  %v2219_v48 = vpop.permute.xlu0 %2218 }
 0x223   : > { %v1863_v49 = vsel %vm273_vm1, %v1858_v42, %v1860_v47  ;;  %1944 = vmatprep.mubr.f32.mxu1 %v3914_v0 }
 0x224   : > { %3745 = vmatprep.subr.mxu1 %v1863_v49 }
 0x225   : > { %3746 = vmatpush3.msra.mxu1 %v1863_v49  ;;  %v3648_v49 = vld [vmem:[%s4389_s3 + $0x88] sm:$0xff] }
 0x226   : > { %v2040_v51 = vpop.permute.xlu1 %2039  ;;  %3602 = vmatmul.mubr.msk.f32.gmra.mrb[4].mxu1 %vm1867_vm11, %v1848_v50  ;;  %v2217_v52 = vpop.permute.xlu0 %2216 }
 0x227   : > { %v2044_v53 = vsel %vm448_vm3, %v2038_v41, %v2040_v51  ;;  %3747 = vmatprep.mubr.msk.f32.mxu1 %vm1867_vm11, %v1847_v45  ;;  %v2224_v1 = vsel %vm621_vm5, %v2217_v52, %v2219_v48  ;;  %v3642_v45 = vld [vmem:[%s4389_s3 + $0x78] sm:$0xff] }
 0x228   : > { %2055 = vmatprep.subr.mxu1 %v2044_v53 }
 0x22a   : > { %v2042_v55 = vpop.permute.xlu1 %2041  ;;  %3748 = vmatmul.mubr.msk.f32.vlgmr.msra.gmra.mrb[6].mxu1 %vm1867_vm11, %v1848_v50  ;;  %v2400_v56 = vpop.permute.xlu0 %2399 }
 0x22b   : > { %2056 = vmatpush1.msra.mxu1 %v2043_v54  ;;  %v2045_v57 = vsel %vm448_vm3, %v2040_v51, %v2042_v55  ;;  %2119 = vmatprep.mubr.f32.mxu1 %v3914_v0 }
 0x22c   : > { %3750 = vmatprep.subr.mxu1 %v2045_v57 }
 0x22e   : > { %v2221_v59 = vpop.permute.xlu1 %2220  ;;  %3607 = vmatmul.mubr.msk.f32.vlgmr.msra.gmra.mrb[2].mxu1 %vm1867_vm11, %v3605_v58  ;;  %v2398_v60 = vpop.permute.xlu0 %2397 }
 0x22f   : > { %3751 = vmatpush3.msra.mxu1 %v2045_v57  ;;  %v2225_v61 = vsel %vm621_vm5, %v2219_v48, %v2221_v59  ;;  %2125 = vmatprep.mubr.f32.mxu1 %v3914_v0  ;;  %v2405_v10 = vsel %vm794_vm6, %v2398_v60, %v2400_v56  ;;  %v3647_v48 = vld [vmem:[%s4389_s3 + $0x80] sm:$0xff] }
 0x230   : > { %2236 = vmatprep.subr.mxu0 %v2225_v61 }
 0x231   : > { %2237 = vmatpush1.msra.mxu0 %v2224_v1 }
 0x232   : > { %v2223_v2 = vpop.permute.xlu1 %2222  ;;  %3608 = vmatmul.mubr.msk.f32.gmra.mrb[4].mxu1 %vm1867_vm11, %v3606_v62  ;;  %3613 = vmatmul.mubr.msk.f32.vlgmr.msra.gmra.mrb[2].mxu0 %vm1867_vm11, %v3611_v63  ;;  %v2756_v3 = vpop.permute.xlu0 %2755 }
 0x233   : > { %v2226_v4 = vsel %vm621_vm5, %v2221_v59, %v2223_v2  ;;  %3752 = vmatprep.mubr.msk.f32.mxu1 %vm1867_vm11, %v3605_v58  ;;  %2306 = vmatprep.mubr.f32.mxu0 %v3914_v0 }
 0x234   : > { %3755 = vmatprep.subr.mxu1 %v2226_v4 }
 0x236   : > { %v2402_v6 = vpop.permute.xlu1 %2401  ;;  %3753 = vmatmul.mubr.msk.f32.vlgmr.msra.gmra.mrb[6].mxu1 %vm1867_vm11, %v3606_v62  ;;  %3614 = vmatmul.mubr.msk.f32.gmra.mrb[4].mxu0 %vm1867_vm11, %v3612_v5  ;;  %v2754_v7 = vpop.permute.xlu0 %2753 }
 0x237   : > { %3756 = vmatpush3.msra.mxu1 %v2226_v4  ;;  %v2406_v8 = vsel %vm794_vm6, %v2400_v56, %v2402_v6  ;;  %2481 = vmatprep.mubr.f32.mxu0 %v3914_v0  ;;  %v2761_v19 = vsel %vm1127_vm7, %v2754_v7, %v2756_v3 }
 0x238   : > { %2417 = vmatprep.subr.mxu0 %v2406_v8  ;;  %3757 = vmatprep.mubr.msk.f32.mxu1 %vm1867_vm11, %v3611_v63 }
 0x239   : > { %2418 = vmatpush1.msra.mxu0 %v2405_v10 }
 0x23a   : > { %v2404_v11 = vpop.permute.xlu1 %2403  ;;  %3619 = vmatmul.mubr.msk.f32.vlgmr.msra.gmra.mrb[2].mxu0 %vm1867_vm11, %v3617_v9  ;;  %2584 = vmatprep.subr.mxu0 %v4177_v34  ;;  %v2937_v12 = vpop.permute.xlu0 %2936  ;;  %v3635_v34 = vld [vmem:[%s4389_s3 + $0x60] sm:$0xff] }
 0x23b   : > { %2585 = vmatpush1.msra.mxu0 %v4171_v27  ;;  %v2407_v13 = vsel %vm794_vm6, %v2402_v6, %v2404_v11  ;;  %2487 = vmatprep.mubr.f32.mxu0 %v3914_v0 }
 0x23c   : > { %3760 = vmatprep.subr.mxu1 %v2407_v13 }
 0x23e   : > { %v2758_v15 = vpop.permute.xlu1 %2757  ;;  %3758 = vmatmul.mubr.msk.f32.vlgmr.msra.gmra.mrb[6].mxu1 %vm1867_vm11, %v3612_v5  ;;  %3620 = vmatmul.mubr.msk.f32.gmra.mrb[4].mxu0 %vm1867_vm11, %v3618_v14  ;;  %v2935_v16 = vpop.permute.xlu0 %2934 }
 0x23f   : > { %3761 = vmatpush3.msra.mxu1 %v2407_v13  ;;  %v2762_v17 = vsel %vm1127_vm7, %v2756_v3, %v2758_v15  ;;  %2648 = vmatprep.mubr.f32.mxu0 %v3914_v0  ;;  %v2942_v27 = vsel %vm1300_vm8, %v2935_v16, %v2937_v12 }
 0x240   : > { %3765 = vmatprep.subr.mxu1 %v4183_v36  ;;  %2773 = vmatprep.subr.mxu0 %v2762_v17 }
 0x241   : > { %3762 = vmatprep.mubr.msk.f32.mxu1 %vm1867_vm11, %v3617_v9 }
 0x242   : > { %v2760_v20 = vpop.permute.xlu1 %2759  ;;  %3625 = vmatmul.mubr.msk.f32.vlgmr.msra.gmra.mrb[2].mxu0 %vm1867_vm11, %v3623_v18  ;;  %v3118_v22 = vpop.permute.xlu0 %3117 }
 0x243   : > { %2774 = vmatpush1.msra.mxu0 %v2761_v19  ;;  %2654 = vmatprep.mubr.f32.mxu0 %v3914_v0  ;;  %v2763_v24 = vsel %vm1127_vm7, %v2758_v15, %v2760_v20 }
 0x246   : > { %v2939_v23 = vpop.permute.xlu1 %2938  ;;  %3763 = vmatmul.mubr.msk.f32.vlgmr.msra.gmra.mrb[6].mxu1 %vm1867_vm11, %v3618_v14  ;;  %3626 = vmatmul.mubr.msk.f32.gmra.mrb[4].mxu0 %vm1867_vm11, %v3624_v21  ;;  %v3116_v29 = vpop.permute.xlu0 %3115 }
 0x247   : > { %3766 = vmatpush3.msra.mxu1 %v4183_v36  ;;  %v2943_v25 = vsel %vm1300_vm8, %v2937_v12, %v2939_v23  ;;  %2837 = vmatprep.mubr.f32.mxu0 %v3914_v0  ;;  %v3123_v36 = vsel %vm1473_vm9, %v3116_v29, %v3118_v22 }
 0x248   : > { %3770 = vmatprep.subr.mxu1 %v2763_v24  ;;  %2954 = vmatprep.subr.mxu0 %v2943_v25 }
 0x249   : > { %3767 = vmatprep.mubr.msk.f32.mxu1 %vm1867_vm11, %v3623_v18 }
 0x24a   : > { %v2941_v28 = vpop.permute.xlu1 %2940  ;;  %3631 = vmatmul.mubr.msk.f32.vlgmr.msra.gmra.mrb[2].mxu0 %vm1867_vm11, %v3629_v26  ;;  %v3299_v35 = vpop.permute.xlu0 %3298 }
 0x24b   : > { %2955 = vmatpush1.msra.mxu0 %v2942_v27  ;;  %2843 = vmatprep.mubr.f32.mxu0 %v3914_v0  ;;  %v2944_v32 = vsel %vm1300_vm8, %v2939_v23, %v2941_v28 }
 0x24e   : > { %v3120_v31 = vpop.permute.xlu1 %3119  ;;  %3768 = vmatmul.mubr.msk.f32.vlgmr.msra.gmra.mrb[6].mxu1 %vm1867_vm11, %v3624_v21  ;;  %3632 = vmatmul.mubr.msk.f32.gmra.mrb[4].mxu0 %vm1867_vm11, %v3630_v30  ;;  %v3297_v40 = vpop.permute.xlu0 %3296 }
 0x24f   : > { %3771 = vmatpush3.msra.mxu1 %v2763_v24  ;;  %v3124_v33 = vsel %vm1473_vm9, %v3118_v22, %v3120_v31  ;;  %3018 = vmatprep.mubr.f32.mxu0 %v3914_v0  ;;  %v3304_v44 = vsel %vm1646_vm10, %v3297_v40, %v3299_v35 }
 0x250   : > { %3775 = vmatprep.subr.mxu1 %v2944_v32  ;;  %3135 = vmatprep.subr.mxu0 %v3124_v33 }
 0x251   : > { %3772 = vmatprep.mubr.msk.f32.mxu1 %vm1867_vm11, %v3629_v26 }
 0x252   : > { %v3122_v37 = vpop.permute.xlu1 %3121  ;;  %3637 = vmatmul.mubr.msk.f32.vlgmr.msra.gmra.mrb[2].mxu0 %vm1867_vm11, %v3635_v34 }
 0x253   : > { %3136 = vmatpush1.msra.mxu0 %v3123_v36  ;;  %3024 = vmatprep.mubr.f32.mxu0 %v3914_v0  ;;  %v3125_v41 = vsel %vm1473_vm9, %v3120_v31, %v3122_v37 }
 0x256   : > { %v3301_v39 = vpop.permute.xlu1 %3300  ;;  %3773 = vmatmul.mubr.msk.f32.vlgmr.msra.gmra.mrb[6].mxu1 %vm1867_vm11, %v3630_v30  ;;  %3638 = vmatmul.mubr.msk.f32.gmra.mrb[4].mxu0 %vm1867_vm11, %v3636_v38 }
 0x257   : > { %3776 = vmatpush3.msra.mxu1 %v2944_v32  ;;  %v3305_v42 = vsel %vm1646_vm10, %v3299_v35, %v3301_v39  ;;  %3199 = vmatprep.mubr.f32.mxu0 %v3914_v0 }
 0x258   : > { %3780 = vmatprep.subr.mxu1 %v3125_v41  ;;  %3316 = vmatprep.subr.mxu0 %v3305_v42 }
 0x259   : > { %3777 = vmatprep.mubr.msk.f32.mxu1 %vm1867_vm11, %v3635_v34 }
 0x25a   : > { %3643 = vmatmul.mubr.msk.f32.vlgmr.msra.gmra.mrb[2].mxu0 %vm1867_vm11, %v3641_v43  ;;  %v3303_v46 = vpop.permute.xlu1 %3302 }
 0x25b   : > { %3317 = vmatpush1.msra.mxu0 %v3304_v44  ;;  %3205 = vmatprep.mubr.f32.mxu0 %v3914_v0  ;;  %v3306_v47 = vsel %vm1646_vm10, %v3301_v39, %v3303_v46 }
 0x25e   : > { %3778 = vmatmul.mubr.msk.f32.vlgmr.msra.gmra.mrb[6].mxu1 %vm1867_vm11, %v3636_v38  ;;  %3644 = vmatmul.mubr.msk.f32.gmra.mrb[4].mxu0 %vm1867_vm11, %v3642_v45 }
 0x25f   : > { %3781 = vmatpush3.msra.mxu1 %v3125_v41  ;;  %3380 = vmatprep.mubr.f32.mxu0 %v3914_v0  ;;  %v1836_v54 = vpop.permute.xlu0 %1835 }
 0x260   : > { %3785 = vmatprep.subr.mxu1 %v3306_v47  ;;  %3782 = vmatprep.mubr.msk.f32.mxu1 %vm1867_vm11, %v3641_v43 }
 0x262   : > { %3649 = vmatmul.mubr.msk.f32.vlgmr.msra.gmra.mrb[2].mxu0 %vm1867_vm11, %v3647_v48 }
 0x263   : > { %3386 = vmatprep.mubr.f32.mxu0 %v3914_v0 }
 0x266   : > { %3783 = vmatmul.mubr.msk.f32.vlgmr.msra.gmra.mrb[6].mxu1 %vm1867_vm11, %v3642_v45  ;;  %3650 = vmatmul.mubr.msk.f32.gmra.mrb[4].mxu0 %vm1867_vm11, %v3648_v49 }
 0x267   : > { %3786 = vmatpush3.msra.mxu1 %v3306_v47  ;;  %3787 = vmatprep.mubr.msk.f32.mxu1 %vm1867_vm11, %v3647_v48 }
 0x26b   : > { %v1841_v56 = vpop.permute.xlu1 %1840 }
 0x26e   : > { %3788 = vmatmul.mubr.msk.f32.vlgmr.msra.gmra.mrb[6].mxu1 %vm1867_vm11, %v3648_v49 }
 0x301   : > { %v2121_v50 = vpop.f32.mrb[2].mxu1 }
 0x302   : > { %v2123_v51 = vpop.f32.mrb[3].mxu1  ;;  %v3793_v0 = vadd.f32 %v2121_v50, %v1836_v54 }
 0x303   : > { %v3795_v55 = vadd.f32 %v2123_v51, %v1836_v54 }
 0x305   : > { %v2127_v52 = vpop.f32.mrb[4].mxu1 }
 0x306   : > { %v2129_v53 = vpop.f32.mrb[5].mxu1  ;;  %v3797_v61 = vadd.f32 %v2127_v52, %v1841_v56 }
 0x307   : > { %v3799_v63 = vadd.f32 %v2129_v53, %v1841_v56 }
 0x335   : > { %v3382_v57 = vpop.f32.mrb[2].mxu0 }
 0x336   : > { %v3794_v58 = vadd.f32 %v3793_v0, %v3382_v57  ;;  %v3384_v59 = vpop.f32.mrb[3].mxu0 }
 0x337   : > { %v3796_v60 = vadd.f32 %v3795_v55, %v3384_v59 }
 0x338   : > { %v3474_v62 = vmax.f32 %v3794_v58, 0.0 }
 0x339   : > { %v3475_v1 = vmax.f32 %v3796_v60, 0.0  ;;  %v3388_v2 = vpop.f32.mrb[4].mxu0 }
 0x33a   : > { %3480 = vst [vmem:[%s251_s18] sm:$0xff] %v3474_v62  ;;  %v3798_v3 = vadd.f32 %v3797_v61, %v3388_v2  ;;  %v3390_v4 = vpop.f32.mrb[5].mxu0 }
 0x33b   : > { %3481 = vst [vmem:[%s251_s18 + $0x8] sm:$0xff] %v3475_v1  ;;  %v3800_v5 = vadd.f32 %v3799_v63, %v3390_v4 }
 0x33c   : > { %v3477_v6 = vmax.f32 %v3798_v3, 0.0 }
 0x33d   : > { %v3478_v7 = vmax.f32 %v3800_v5, 0.0 }
 0x33e   : > { %3483 = vst [vmem:[%s251_s18 + $0x18] sm:$0xff] %v3477_v6 }
 0x33f   : > { %3484 = vst [vmem:[%s251_s18 + $0x20] sm:$0xff] %v3478_v7 }
 0x341   : > { %v3789_v8 = vpop.f32.mrb[6].mxu1 }
 0x342   : > { %v3801_v9 = vadd.f32 %v3789_v8, %v1841_v56  ;;  %v3459_v10 = vpop.f32.mrb[7].mxu1 }
 0x343   : > { %v3802_v11 = vadd.f32 %v3459_v10, %v1836_v54 }
 0x344   : > { %v3479_v12 = vmax.f32 %v3801_v9, 0.0 }
 0x345   : > { %v3476_v13 = vmax.f32 %v3802_v11, 0.0 }
 0x346   : > { %3485 = vst [vmem:[%s251_s18 + $0x28] sm:$0xff] %v3479_v12 }
 0x347   : > { %3482 = vst [vmem:[%s251_s18 + $0x10] sm:$0xff] %v3476_v13 }
 0x348 PF: > { %s16_s21 = sadd.s32 1, %s3912_s21  }
 0x349   : > { %p13_p4 = scmp.ge.s32.totalorder %s16_s21, 4  }
 0x34b   :  { %15 = sbr.rel (!%p13_p4) target bundleno = 1 (0x1), region = 90 }

</bundles_post_ra>
